<compile_context>
chip_gen: v6e
topology: v6e:2x2x1
jax: 0.10.0
libtpu: 0.0.40
codegen_flags: <defaults>
</compile_context>

<pallas_src>
import functools

import jax
import jax.numpy as jnp
from jax.experimental import pallas as pl
from jax.experimental.pallas import tpu as pltpu


def _uncertainty_kernel(b_ref, w_ref, x_ref, o_ref, *, C, H, W, NB):
    # b_ref: SMEM (1,) f32 bias
    # w_ref: VMEM (9, C)        conv weights, tap-major: w_ref[ky*3+kx, c]
    # x_ref: VMEM (NB, C, H*W)  input batch tile (lane axis = flattened H*W)
    # o_ref: VMEM (NB, 1, H*W)  output batch tile
    HW = H * W
    PAD = W + 1  # covers the largest flat shift |dy*W + dx| = W + 1

    w9 = w_ref[...]                                            # (9, C)
    bias_row = jnp.full((1, HW), b_ref[0], dtype=jnp.float32)  # hoisted broadcast

    # Column-position masks for the horizontal taps; together with the zero
    # extension below they exactly reproduce Conv2d's zero padding (not
    # replication, no cross-row bleed).
    col = jax.lax.broadcasted_iota(jnp.int32, (1, HW), 1) % W
    not_first_col = col != 0          # valid output columns for kx = 0 taps
    not_last_col = col != (W - 1)     # valid output columns for kx = 2 taps

    zpad = jnp.zeros((9, PAD), dtype=jnp.float32)

    for b in range(NB):
        xb = x_ref[b]                                          # (C, HW)
        # Contract the channel dimension for all 9 taps at once on the MXU.
        taps = jnp.dot(
            w9, xb,
            preferred_element_type=jnp.float32,
            precision=jax.lax.Precision.HIGHEST,
        )                                                      # (9, HW) f32
        # Zero-extend along the flat spatial axis so vertically out-of-range taps
        # read zeros (the conv's zero halo) without any extra HBM traffic.
        tpad = jnp.concatenate([zpad, taps, zpad], axis=1)     # (9, HW + 2*PAD)

        left = None   # kx == 0 taps (need not_first_col mask)
        mid = None    # kx == 1 taps (no mask)
        right = None  # kx == 2 taps (need not_last_col mask)
        for ky in range(3):
            for kx in range(3):
                t = ky * 3 + kx
                off = (ky - 1) * W + (kx - 1)
                sl = tpad[t:t + 1, PAD + off:PAD + off + HW]   # (1, HW)
                if kx == 0:
                    left = sl if left is None else left + sl
                elif kx == 1:
                    mid = sl if mid is None else mid + sl
                else:
                    right = sl if right is None else right + sl

        acc = (bias_row + mid
               + jnp.where(not_first_col, left, 0.0)
               + jnp.where(not_last_col, right, 0.0))
        o_ref[b] = jnp.exp(acc).astype(o_ref.dtype)


def _pick_batch_tile(N, C, HW, itemsize=4, vmem_budget_bytes=8 * 1024 * 1024):
    # Largest divisor of N that (a) keeps the per-step input block within a VMEM
    # budget (Pallas double-buffers it) and (b) leaves >= 2 grid steps when
    # possible so both v7x TensorCores have work (harmless on v5e/v6e).
    per_image = max(C * HW * itemsize, 1)
    cap = max(1, vmem_budget_bytes // per_image)
    divs = [d for d in range(1, N + 1) if N % d == 0 and d <= cap]
    pref = [d for d in divs if N // d >= 2]
    return max(pref) if pref else max(divs)


def uncertainty_forward(x, weight, bias):
    """x: (N, C, H, W); weight: (1, C, 3, 3); bias: (1,). Returns exp(conv2d(x)+b), (N, 1, H, W)."""
    N, C, H, W = x.shape
    HW = H * W

    # Free, contiguous reshape: flattened spatial axis becomes the (lane-dense) last dim.
    x_flat = x.reshape(N, C, HW)
    # (1, C, 3, 3) -> (9, C), tap-major (ky*3 + kx).
    w9 = jnp.transpose(weight.reshape(C, 9), (1, 0)).astype(x.dtype)
    b = bias.astype(jnp.float32)

    NB = _pick_batch_tile(N, C, HW, itemsize=x.dtype.itemsize)
    grid = (N // NB,)

    kernel = functools.partial(_uncertainty_kernel, C=C, H=H, W=W, NB=NB)

    out_flat = pl.pallas_call(
        kernel,
        out_shape=jax.ShapeDtypeStruct((N, 1, HW), x.dtype),
        grid=grid,
        in_specs=[
            pl.BlockSpec(memory_space=pltpu.MemorySpace.SMEM),   # bias (scalar)
            pl.BlockSpec((9, C), lambda g: (0, 0)),              # weights (grid-invariant)
            pl.BlockSpec((NB, C, HW), lambda g: (g, 0, 0)),      # input batch tile
        ],
        out_specs=pl.BlockSpec((NB, 1, HW), lambda g: (g, 0, 0)),
        compiler_params=pltpu.CompilerParams(
            dimension_semantics=("parallel",),
        ),
    )(b, w9, x_flat)
    return out_flat.reshape(N, 1, H, W)


def _reference(x, weight, bias):
    # Pure JAX reference of nn.Conv2d(C, 1, 3, padding=1) + exp, NCHW.
    y = jax.lax.conv_general_dilated(
        x, weight,
        window_strides=(1, 1),
        padding=((1, 1), (1, 1)),
        dimension_numbers=("NCHW", "OIHW", "NCHW"),
        precision=jax.lax.Precision.HIGHEST,
    )
    return jnp.exp(y + bias.reshape(1, -1, 1, 1))


if __name__ == "__main__":
    key = jax.random.PRNGKey(0)
    kx, kw, kb = jax.random.split(key, 3)

    N, C, H, W = 2, 4, 16, 16
    x = jax.random.normal(kx, (N, C, H, W), dtype=jnp.float32)

    # Deterministic parameter init (PyTorch-style uniform bound = 1/sqrt(fan_in)).
    fan_in = C * 3 * 3
    bound = 1.0 / (fan_in ** 0.5)
    weight = jax.random.uniform(kw, (1, C, 3, 3), jnp.float32, -bound, bound)
    bias = jax.random.uniform(kb, (1,), jnp.float32, -bound, bound)

    out = uncertainty_forward(x, weight, bias)
    out = jax.block_until_ready(out)

    ref = jax.block_until_ready(_reference(x, weight, bias))
    assert out.shape == (N, 1, H, W), out.shape
    assert jnp.allclose(out, ref, atol=1e-4, rtol=1e-4), float(jnp.max(jnp.abs(out - ref)))

    print("KERNEL_OK")
</pallas_src>

<mosaic_0001>
module attributes {stable_mosaic.version = 11 : i64} {
  func.func @_uncertainty_kernel(%arg0: i32, %arg1: memref<1xf32, #tpu.memory_space<smem>>, %arg2: memref<9x4xf32, #tpu.memory_space<vmem>>, %arg3: memref<1x4x256xf32, #tpu.memory_space<vmem>>, %arg4: memref<1x1x256xf32, #tpu.memory_space<vmem>>) attributes {dimension_semantics = [#tpu.dimension_semantics<parallel>], iteration_bounds = array<i64: 2>, scalar_prefetch = 0 : i64, scratch_operands = 0 : i64, tpu.core_type = #tpu.core_type<tc>, window_params = [{transform_indices = @transform_0, window_bounds = array<i64: 1>}, {pipeline_mode = #tpu.pipeline_mode<synchronous>, transform_indices = @transform_1, window_bounds = array<i64: 9, 4>}, {transform_indices = @transform_2, window_bounds = array<i64: 1, 4, 256>}, {transform_indices = @transform_3, window_bounds = array<i64: 1, 1, 256>}]} {
    %c0 = arith.constant 0 : index
    %c0_0 = arith.constant 0 : index
    %0 = vector.load %arg2[%c0, %c0_0] : memref<9x4xf32, #tpu.memory_space<vmem>>, vector<9x4xf32>
    %c0_1 = arith.constant 0 : index
    %1 = memref.load %arg1[%c0_1] : memref<1xf32, #tpu.memory_space<smem>>
    %2 = vector.broadcast %1 : f32 to vector<1x256xf32>
    %3 = tpu.iota {dimensions = array<i32: 1>} : vector<1x256xi32>
    %c16_i32 = arith.constant 16 : i32
    %c0_i32 = arith.constant 0 : i32
    %4 = arith.cmpi eq, %c16_i32, %c0_i32 : i32
    %c1_i32 = arith.constant 1 : i32
    %5 = arith.select %4, %c1_i32, %c16_i32 : i32
    %6 = vector.broadcast %5 : i32 to vector<1x256xi32>
    %7 = arith.remsi %3, %6 : vector<1x256xi32>
    %c0_i32_2 = arith.constant 0 : i32
    %8 = vector.broadcast %c0_i32_2 : i32 to vector<1x256xi32>
    %9 = arith.cmpi ne, %7, %8 : vector<1x256xi32>
    %c0_i32_3 = arith.constant 0 : i32
    %10 = vector.broadcast %c0_i32_3 : i32 to vector<1x256xi32>
    %11 = arith.cmpi slt, %7, %10 : vector<1x256xi32>
    %c0_i32_4 = arith.constant 0 : i32
    %12 = arith.cmpi slt, %5, %c0_i32_4 : i32
    %13 = vector.broadcast %12 : i1 to vector<1x256xi1>
    %14 = vector.broadcast %13 : vector<1x256xi1> to vector<1x256xi1>
    %15 = arith.xori %11, %14 : vector<1x256xi1>
    %16 = arith.andi %15, %9 : vector<1x256xi1>
    %17 = vector.broadcast %5 : i32 to vector<1x256xi32>
    %18 = arith.addi %7, %17 : vector<1x256xi32>
    %19 = arith.select %16, %18, %7 : vector<1x256xi1>, vector<1x256xi32>
    %c0_i32_5 = arith.constant 0 : i32
    %20 = vector.broadcast %c0_i32_5 : i32 to vector<1x256xi32>
    %21 = arith.cmpi ne, %19, %20 : vector<1x256xi32>
    %c15_i32 = arith.constant 15 : i32
    %22 = vector.broadcast %c15_i32 : i32 to vector<1x256xi32>
    %23 = arith.cmpi ne, %19, %22 : vector<1x256xi32>
    %cst = arith.constant 0.000000e+00 : f32
    %24 = vector.broadcast %cst : f32 to vector<9x17xf32>
    %c0_6 = arith.constant 0 : index
    %c0_7 = arith.constant 0 : index
    %c0_8 = arith.constant 0 : index
    %25 = vector.load %arg3[%c0_6, %c0_7, %c0_8] : memref<1x4x256xf32, #tpu.memory_space<vmem>>, vector<1x4x256xf32>
    %26 = vector.shape_cast %25 : vector<1x4x256xf32> to vector<4x256xf32>
    %cst_9 = arith.constant dense<0.000000e+00> : vector<9x256xf32>
    %27 = tpu.matmul %0, %26, %cst_9 {dimension_numbers = #tpu.dot_dimension_numbers<[1], [0], [0], [1], [0, 0, 1, 1], [], []>, precision = #tpu.contract_precision<fp32>} : vector<9x4xf32>, vector<4x256xf32>, vector<9x256xf32> -> vector<9x256xf32>
    %28 = tpu.concatenate %24, %27, %24 in 1 : vector<9x17xf32>, vector<9x256xf32>, vector<9x17xf32> -> vector<9x290xf32>
    %29 = vector.extract_strided_slice %28 {offsets = [0, 0], sizes = [1, 256], strides = [1, 1]} : vector<9x290xf32> to vector<1x256xf32>
    %30 = vector.extract_strided_slice %28 {offsets = [1, 1], sizes = [1, 256], strides = [1, 1]} : vector<9x290xf32> to vector<1x256xf32>
    %31 = vector.extract_strided_slice %28 {offsets = [2, 2], sizes = [1, 256], strides = [1, 1]} : vector<9x290xf32> to vector<1x256xf32>
    %32 = vector.extract_strided_slice %28 {offsets = [3, 16], sizes = [1, 256], strides = [1, 1]} : vector<9x290xf32> to vector<1x256xf32>
    %33 = arith.addf %29, %32 : vector<1x256xf32>
    %34 = vector.extract_strided_slice %28 {offsets = [4, 17], sizes = [1, 256], strides = [1, 1]} : vector<9x290xf32> to vector<1x256xf32>
    %35 = arith.addf %30, %34 : vector<1x256xf32>
    %36 = vector.extract_strided_slice %28 {offsets = [5, 18], sizes = [1, 256], strides = [1, 1]} : vector<9x290xf32> to vector<1x256xf32>
    %37 = arith.addf %31, %36 : vector<1x256xf32>
    %38 = vector.extract_strided_slice %28 {offsets = [6, 32], sizes = [1, 256], strides = [1, 1]} : vector<9x290xf32> to vector<1x256xf32>
    %39 = arith.addf %33, %38 : vector<1x256xf32>
    %40 = vector.extract_strided_slice %28 {offsets = [7, 33], sizes = [1, 256], strides = [1, 1]} : vector<9x290xf32> to vector<1x256xf32>
    %41 = arith.addf %35, %40 : vector<1x256xf32>
    %42 = vector.extract_strided_slice %28 {offsets = [8, 34], sizes = [1, 256], strides = [1, 1]} : vector<9x290xf32> to vector<1x256xf32>
    %43 = arith.addf %37, %42 : vector<1x256xf32>
    %44 = arith.addf %2, %41 : vector<1x256xf32>
    %cst_10 = arith.constant 0.000000e+00 : f32
    %45 = vector.broadcast %cst_10 : f32 to vector<1x256xf32>
    %46 = arith.select %21, %39, %45 : vector<1x256xi1>, vector<1x256xf32>
    %47 = arith.addf %44, %46 : vector<1x256xf32>
    %cst_11 = arith.constant 0.000000e+00 : f32
    %48 = vector.broadcast %cst_11 : f32 to vector<1x256xf32>
    %49 = arith.select %23, %43, %48 : vector<1x256xi1>, vector<1x256xf32>
    %50 = arith.addf %47, %49 : vector<1x256xf32>
    %51 = math.exp %50 : vector<1x256xf32>
    %c0_12 = arith.constant 0 : index
    %c0_13 = arith.constant 0 : index
    %c0_14 = arith.constant 0 : index
    %52 = vector.load %arg4[%c0_12, %c0_13, %c0_14] : memref<1x1x256xf32, #tpu.memory_space<vmem>>, vector<1x1x256xf32>
    %53 = vector.shape_cast %52 : vector<1x1x256xf32> to vector<1x256xf32>
    %54 = vector.shape_cast %51 : vector<1x256xf32> to vector<1x1x256xf32>
    tpu.vector_store %arg4[%c0_12, %c0_13, %c0_14], %54 {strides = array<i32>} : memref<1x1x256xf32, #tpu.memory_space<vmem>>, vector<1x1x256xf32>,
    return
  }
  func.func @transform_0(%arg0: i32) -> i32 {
    %c0_i32 = arith.constant 0 : i32
    %c0_i32_0 = arith.constant 0 : i32
    return %c0_i32 : i32
  }
  func.func @transform_1(%arg0: i32) -> (i32, i32) {
    %c0_i32 = arith.constant 0 : i32
    %c0_i32_0 = arith.constant 0 : i32
    %c0_i32_1 = arith.constant 0 : i32
    return %c0_i32, %c0_i32_0 : i32, i32
  }
  func.func @transform_2(%arg0: i32) -> (i32, i32, i32) {
    %c0_i32 = arith.constant 0 : i32
    %c0_i32_0 = arith.constant 0 : i32
    %c0_i32_1 = arith.constant 0 : i32
    return %arg0, %c0_i32, %c0_i32_0 : i32, i32, i32
  }
  func.func @transform_3(%arg0: i32) -> (i32, i32, i32) {
    %c0_i32 = arith.constant 0 : i32
    %c0_i32_0 = arith.constant 0 : i32
    %c0_i32_1 = arith.constant 0 : i32
    return %arg0, %c0_i32, %c0_i32_0 : i32, i32, i32
  }
}

</mosaic_0001>

<bundles_post_ra>
// kernel: tpu_custom_call.1
= control target key start
LH: loop header
LB: loop body
LE: loop exit
PB: predicated region body
PF: predicated region fallthrough
CT: control target
= control target key end

     0   :  { %s1273_s0 = inlined_call_operand.<no memory space> [shape: f32[1], index: 0, kind: input, shape index: {}]   ;;  %s1274_s1 = inlined_call_operand.vmem [shape: f32[9,4], index: 1, kind: input, shape index: {}]   ;;  %s1275_s2 = inlined_call_operand.vmem [shape: f32[2,4,256], index: 2, kind: input, shape index: {}]   ;;  %s1276_s3 = inlined_call_operand.hbm [shape: f32[2,1,256], index: 3, kind: output, shape index: {}]  }
   0x1   :  { %8 = sst [smem:[#allocation2]] %s1273_s0 }
   0x2   :  { %9 = vsyncpa [#allocation4], 0 }
   0x3   :  { %11 = vsyncpa [#allocation4 + $0x1], 0  ;;  %s1149_s14 = smov 0   ;;  %s1151_s15 = smov 0  }
   0x4   :  { %s1153_s16 = smov 0   ;;  %s1155_s17 = smov 0  }
   0x5 LB: > { %s1170_s0 = sadd.s32 4294967295, %s1115_s17   ;;  %s987_s18 = sadd.s32 4294967294, %s1115_s17   ;;  %s1115_s17 = sphi %s1155_s17, %s1282_s17   ;;  %s1111_s16 = sphi %s1153_s16, %s1281_s16   ;;  %s1107_s15 = sphi %s1151_s15, %s1280_s15   ;;  %s1103_s14 = sphi %s1149_s14, %s1279_s14  }
   0x6   : > { %s1174_s19 = sadd.s32 1, %s1115_s17   ;;  %s92_s20 = sadd.s32 1, %s1111_s16 }
   0x7   : > { %s89_s21 = ssub.s32 %s1115_s17, %s1174_s19  ;;  %p102_p0 = scmp.ne.s32.totalorder %s1111_s16, %s1107_s15 }
   0x8   : > { %p90_p1 = scmp.eq.s32.totalorder %s89_s21, 0  ;;  %p103_p2 = scmp.eq.s32.totalorder %s1170_s0, 1 }
   0x9   : > { %p108_p3 = scmp.ne.s32.totalorder %s1107_s15, %s1103_s14  ;;  %p109_p4 = scmp.eq.s32.totalorder %s987_s18, 1 }
   0xa   : > { %s1185_s22 = scalar_select %p90_p1, %s1111_s16, %s92_s20  }
   0xb   : > { %p1187_p5 = por %p103_p2, %p102_p0  ;;  %p1191_p6 = por %p109_p4, %p108_p3 }
   0xc   : > { %p990_p7 = scmp.ge.s32.totalorder %s1115_s17, 1  ;;  %p141_p8 = scmp.lt.s32.totalorder %s1115_s17, 3 }
   0xe   : > { %p142_p9 = pnand %p990_p7, %p141_p8 }
   0xf   : > { %p165_p10 = scmp.lt.s32.totalorder (!%p142_p9), %s1170_s0, 1  ;;  %s1118_s7 = smov (!%p142_p9), 17  }
  0x10   : > { %145 = sbr.rel (%p142_p9) target bundleno = 894 (0x37e), region = 32  ;;  %s1119_s8 = smov (!%p142_p9), 112  }
  0x11   : > { %s1120_s9 = smov (!%p142_p9), 96   ;;  %s1121_s10 = smov (!%p142_p9), 126  }
  0x12   : > { %s1122_s11 = smov (!%p142_p9), 1   ;;  %s172_s12 = sld [smem:[#allocation2]] (!%p142_p9) }
  0x13   : > { %s1124_s13 = smov (!%p142_p9), 127   ;;  %s162_s18 = sand.u32 (!%p142_p9), 1, %s1107_s15  }
  0x14   : > { %s991_s20 = sshll.u32 (!%p142_p9), %s162_s18, 1  ;;  %s1000_s21 = sshll.u32 (!%p142_p9), %s1170_s0, 5 }
  0x15   : > { %v170_v0 = vld [vmem:[%s1274_s1] sm:$0xff]  ;;  %vm208_vm0 = vcmask 31744   ;;  %v1117_v1 = vmov 0.0   ;;  %v171_v3 = vld [vmem:[%s1274_s1 + $0x8] sm:$0x1]  ;;  %s166_s29 = scalar_select %p165_p10, %s1170_s0, 1 }
  0x16   : > { %286 = vmatprep.mubr.f32.mxu0 %v1117_v1  ;;  %v210_v2 = vsel %vm208_vm0, %v170_v0, 0  ;;  %383 = vmatprep.mubr.f32.mxu1 %v1117_v1  ;;  %v213_v5 = vsel %vm208_vm0, %v171_v3, 0  ;;  %vm215_vm1 = vcmask 1043456   ;;  %vm746_vm2 = vcmask 138240   ;;  %s164_s25 = scalar_lea.vmem [#allocation3], %s991_s20  ;;  %s1125_s0 = smov [#allocation3]  }
  0x17   : > { %v287_v4 = vand.u32 4294901760, %v210_v2  ;;  %v298_v6 = vand.u32 4294901760, %v213_v5  ;;  %s999_s30 = sshll.u32 %s166_s29, 3  ;;  %vm769_vm3 = vcmask 916480   ;;  %vm787_vm4 = vcmask 785408   ;;  %s928_s26 = sshll.u32 %s164_s25, 4  ;;  %s929_s26 = int_to_ptr.vmem [resolvable:$true] %s928_s26 }
  0x18   : > { %s169_s6 = scalar_lea.vmem %s1275_s2, %s999_s30  ;;  %vm848_vm7 = vcmask 1031168   ;;  %vm828_vm10 = vcmask 7168   ;;  %vm905_vm11 = vcmask 1039360   ;;  %s1238_s29 = scalar_lea.hbm %s1276_s3, %s1000_s21 }
  0x19   : > { %v288_v7 = vsub.f32 %v210_v2, %v287_v4  ;;  %v299_v8 = vsub.f32 %v213_v5, %v298_v6  ;;  %v205_v9 = vld [vmem:[%s169_s6] sm:$0xff]  ;;  %s914_s30 = scalar_lea.sflag [#allocation4], %s162_s18  ;;  %s1055_s4 = scalar_lea.vmem %s929_s26, 32 }
  0x1a   : > { %v207_v11 = vcombine.high %v205_v9, %v205_v9  ;;  %v216_v12 = vsel %vm215_vm1, %v205_v9, 0  ;;  %p1056_p11 = scmp.ne.s32.totalorder %s929_s26, %s1055_s4  ;;  %s1059_s5 = sshll.u32 %s1125_s0, 4  ;;  %s1060_s5 = int_to_ptr.vmem [resolvable:$false] %s1059_s5 }
  0x1b   : > { %v289_v10 = vand.u32 4294901760, %v288_v7  ;;  %v300_v13 = vand.u32 4294901760, %v299_v8  ;;  %v252_v14 = vand.u32 4294901760, %v216_v12  ;;  %s1061_s6 = scalar_lea.vmem %s1060_s5, 64  ;;  %p1062_p0 = scmp.lt.s32.totalorder %s929_s26, %s1060_s5 }
  0x1c   : > { %v218_v16 = vsel %vm215_vm1, %v207_v11, 0  ;;  %p1057_p12 = pnand %p1056_p11, %p1187_p5  ;;  %p1063_p1 = scmp.lt.s32.totalorder %s1061_s6, %s1055_s4 }
  0x1d   : > { %v290_v15 = vsub.f32 %v288_v7, %v289_v10  ;;  %v250_v17 = vand.u32 4294901760, %v218_v16  ;;  %v301_v19 = vsub.f32 %v299_v8, %v300_v13  ;;  %v346_v20 = vsub.f32 %v216_v12, %v252_v14 }
  0x1e   : > { %p1058_p13 = pneg %p1057_p12  ;;  %p1064_p2 = por %p1063_p1, %p1062_p0 }
  0x1f   : > { %v291_v18 = vand.u32 4294901760, %v290_v15  ;;  %251 = vmatprep.subr.mxu0 %v250_v17  ;;  %v340_v21 = vsub.f32 %v218_v16, %v250_v17  ;;  %v347_v22 = vand.u32 4294901760, %v346_v20  ;;  %v302_v23 = vand.u32 4294901760, %v301_v19 }
  0x20   : > { %253 = vmatpush1.msra.mxu0 %v252_v14  ;;  %p1065_p3 = pnand %p1064_p2, %p1058_p13 }
  0x21   : > { %292 = vmatmul.mubr.f32.vlgmr.msra.gmra.mxu0 %v291_v18  ;;  %v341_v24 = vand.u32 4294901760, %v340_v21  ;;  %430 = vmatprep.subr.mxu0 %v340_v21  ;;  %v348_v25 = vsub.f32 %v346_v20, %v347_v22 }
  0x22   : > { %297 = vmatprep.mubr.f32.mxu0 %v1117_v1  ;;  %433 = vmatpush1.msra.mxu0 %v346_v20 }
  0x23   : > { %v342_v26 = vsub.f32 %v340_v21, %v341_v24  ;;  %601 = vmatprep.subr.mxu0 %v341_v24  ;;  %v349_v27 = vand.u32 4294901760, %v348_v25 }
  0x25   : > { %303 = vmatmul.mubr.f32.gmra.mxu0 %v302_v23  ;;  %v343_v28 = vand.u32 4294901760, %v342_v26 }
  0x26   : > { %466 = vmatprep.mubr.f32.mxu0 %v1117_v1 }
  0x27   : > { %344 = vmatprep.subr.mxu1 %v343_v28 }
  0x28   : > { %350 = vmatpush1.msra.mxu1 %v349_v27 }
  0x29   : > { %385 = vmatmul.mubr.f32.vlgmr.msra.gmra.mxu1 %v287_v4  ;;  %514 = vmatprep.subr.mxu1 %v250_v17 }
  0x2a   : > { %516 = vmatpush1.msra.mxu1 %v252_v14  ;;  %469 = vmatmul.mubr.f32.vlgmr.msra.gmra.mxu0 %v288_v7 }
  0x2b   : > { %390 = vmatprep.mubr.f32.mxu1 %v1117_v1  ;;  %474 = vmatprep.mubr.f32.mxu0 %v1117_v1 }
  0x2c   : > { %605 = vmatpush1.msra.mxu0 %v347_v22  ;;  %684 = vmatprep.subr.mxu1 %v250_v17 }
  0x2d   : > { %392 = vmatmul.mubr.f32.gmra.mxu1 %v298_v6 }
  0x2e   : > { %477 = vmatmul.mubr.f32.gmra.mxu0 %v299_v8  ;;  %549 = vmatprep.mubr.f32.mxu1 %v1117_v1 }
  0x2f   : > { %638 = vmatprep.mubr.f32.mxu0 %v1117_v1 }
  0x31   : > { %553 = vmatmul.mubr.f32.vlgmr.msra.gmra.mxu1 %v289_v10 }
  0x32   : > { %686 = vmatpush1.msra.mxu1 %v252_v14  ;;  %640 = vmatmul.mubr.f32.vlgmr.msra.gmra.mxu0 %v287_v4 }
  0x33   : > { %558 = vmatprep.mubr.f32.mxu1 %v1117_v1  ;;  %645 = vmatprep.mubr.f32.mxu0 %v1117_v1 }
  0x35   : > { %562 = vmatmul.mubr.f32.gmra.mxu1 %v300_v13 }
  0x36   : > { %647 = vmatmul.mubr.f32.gmra.mxu0 %v298_v6  ;;  %719 = vmatprep.mubr.f32.mxu1 %v1117_v1 }
  0x39   : > { %721 = vmatmul.mubr.f32.vlgmr.msra.gmra.mxu1 %v287_v4 }
  0x3a   : > { %726 = vmatprep.mubr.f32.mxu1 %v1117_v1 }
  0x3d   : > { %728 = vmatmul.mubr.f32.gmra.mxu1 %v298_v6 }
  0xe1   : > { %v293_v29 = vpop.f32.mrf.mxu0 }
  0xe3   : > { %v295_v30 = vpop.f32.mrf.mxu0 }
  0xe5   : > { %v304_v31 = vpop.f32.mrf.mxu0 }
  0xe7   : > { %v306_v32 = vpop.f32.mrf.mxu0 }
  0xe9   : > { %v386_v33 = vpop.f32.mrf.mxu1 }
  0xea   : > { %v470_v34 = vpop.f32.mrf.mxu0  ;;  %v387_v38 = vadd.f32 %v386_v33, %v293_v29  ;;  %v174_v29 = vlaneseq }
  0xeb   : > { %v388_v35 = vpop.f32.mrf.mxu1 }
  0xec   : > { %v472_v36 = vpop.f32.mrf.mxu0  ;;  %v389_v43 = vadd.f32 %v388_v35, %v295_v30  ;;  %v471_v44 = vadd.f32 %v470_v34, %v387_v38  ;;  %v175_v33 = vand.u32 127, %v174_v29  ;;  %vm910_vm12 = vcmp.lt.s32.totalorder %v174_v29, 256 }
  0xed   : > { %v393_v37 = vpop.f32.mrf.mxu1 }
  0xee   : > { %v478_v39 = vpop.f32.mrf.mxu0  ;;  %v394_v45 = vadd.f32 %v393_v37, %v304_v31  ;;  %v473_v51 = vadd.f32 %v472_v36, %v389_v43 }
  0xef   : > { %v395_v40 = vpop.f32.mrf.mxu1 }
  0xf0   : > { %v480_v41 = vpop.f32.mrf.mxu0  ;;  %v396_v52 = vadd.f32 %v395_v40, %v306_v32  ;;  %v479_v53 = vadd.f32 %v478_v39, %v394_v45  ;;  %v176_v39 = vadd.s32 128, %v175_v33 }
  0xf1   : > { %v554_v42 = vpop.f32.mrf.mxu1 }
  0xf2   : > { %v641_v46 = vpop.f32.mrf.mxu0  ;;  %v555_v48 = vadd.f32 %v554_v42, %v471_v44  ;;  %v481_v60 = vadd.f32 %v480_v41, %v396_v52 }
  0xf3   : > { %v556_v47 = vpop.f32.mrf.mxu1 }
  0xf4   : > { %v643_v50 = vpop.f32.mrf.mxu0  ;;  %v557_v55 = vadd.f32 %v556_v47, %v473_v51  ;;  %v642_v56 = vadd.f32 %v641_v46, %v555_v48  ;;  %v188_v48 = vand.u32 15, %v176_v39 }
  0xf5   : > { %v563_v49 = vpop.f32.mrf.mxu1 }
  0xf6   : > { %v564_v57 = vadd.f32 %v563_v49, %v479_v53  ;;  %v648_v58 = vpop.f32.mrf.mxu0  ;;  %v644_v63 = vadd.f32 %v643_v50, %v557_v55  ;;  %v181_v49 = vand.u32 15, %v175_v33  ;;  %vm202_vm5 = vcmp.ne.s32.totalorder %v188_v48, 0 }
  0xf7   : > { %v565_v54 = vpop.f32.mrf.mxu1  ;;  %vm204_vm9 = vcmp.ne.s32.totalorder %v188_v48, 15 }
  0xf8   : > { %v566_v0 = vadd.f32 %v565_v54, %v481_v60  ;;  %v649_v1 = vadd.f32 %v648_v58, %v564_v57  ;;  %v650_v2 = vpop.f32.mrf.mxu0  ;;  %vm201_vm6 = vcmp.ne.s32.totalorder %v181_v49, 0  ;;  %vm203_vm8 = vcmp.ne.s32.totalorder %v181_v49, 15 }
  0xf9   : > { %v722_v59 = vpop.f32.mrf.mxu1 }
  0xfa   : > { %v723_v61 = vadd.f32 %v722_v59, %v642_v56  ;;  %v651_v7 = vadd.f32 %v650_v2, %v566_v0 }
  0xfb   : > { %v724_v62 = vpop.f32.mrf.mxu1 }
  0xfc   : > { %738 = vrot.lane.b32.xlu0 %v723_v61, %s1118_s7  ;;  %v725_v4 = vadd.f32 %v724_v62, %v644_v63 }
  0xfd   : > { %v729_v3 = vpop.f32.mrf.mxu1 }
  0xfe   : > { %v730_v5 = vadd.f32 %v729_v3, %v649_v1 }
  0xff   : > { %v731_v6 = vpop.f32.mrf.mxu1 }
 0x100   : > { %742 = vrot.lane.b32.xlu1 %v730_v5, %s1118_s7  ;;  %740 = vrot.lane.b32.xlu0 %v725_v4, %s1118_s7  ;;  %v732_v8 = vadd.f32 %v731_v6, %v651_v7 }
 0x104   : > { %744 = vrot.lane.b32.xlu1 %v732_v8, %s1118_s7 }
 0x16e   : > { %v739_v9 = vpop.permute.xlu0 %738 }
 0x16f   : > { %v754_v10 = vsel %vm746_vm2, 0.0, %v739_v9 }
 0x170   : > { %v760_v11 = vrot.slane %v754_v10, 3  ;;  %v778_v25 = vrot.slane %v754_v10, 6 }
 0x172   : > { %v743_v12 = vpop.permute.xlu1 %742  ;;  %763 = vrot.lane.b32.xlu0 %v760_v11, %s1119_s8  ;;  %v741_v13 = vpop.permute.xlu0 %740 }
 0x173   : > { %v747_v14 = vsel %vm746_vm2, %v739_v9, %v741_v13  ;;  %v756_v15 = vsel %vm746_vm2, %v741_v13, 0.0  ;;  %v755_v18 = vsel %vm746_vm2, 0.0, %v743_v12  ;;  %v173_v9 = vstv %s172_s12 }
 0x174   : > { %v762_v16 = vrot.slane %v756_v15, 3  ;;  %v761_v17 = vrot.slane %v747_v14, 3  ;;  %v798_v21 = vrot.slane %v755_v18, 6  ;;  %v779_v26 = vrot.slane %v747_v14, 6 }
 0x175   : > { %v780_v27 = vrot.slane %v756_v15, 6 }
 0x176   : > { %767 = vrot.lane.b32.xlu0 %v762_v16, %s1119_s8  ;;  %765 = vrot.lane.b32.xlu1 %v761_v17, %s1119_s8  ;;  %v745_v19 = vpop.permute.xlu1 %744 }
 0x177   : > { %v748_v20 = vsel %vm746_vm2, %v743_v12, %v745_v19  ;;  %v757_v23 = vsel %vm746_vm2, %v745_v19, 0.0 }
 0x178   : > { %v799_v22 = vrot.slane %v748_v20, 6  ;;  %v800_v24 = vrot.slane %v757_v23, 6 }
 0x17a   : > { %801 = vrot.lane.b32.xlu1 %v798_v21, %s1120_s9  ;;  %803 = vrot.lane.b32.xlu0 %v799_v22, %s1120_s9 }
 0x17e   : > { %805 = vrot.lane.b32.xlu1 %v800_v24, %s1120_s9  ;;  %781 = vrot.lane.b32.xlu0 %v778_v25, %s1120_s9 }
 0x182   : > { %783 = vrot.lane.b32.xlu1 %v779_v26, %s1120_s9  ;;  %785 = vrot.lane.b32.xlu0 %v780_v27, %s1120_s9 }
 0x1e4   : > { %v764_v28 = vpop.permute.xlu0 %763 }
 0x1e8   : > { %v768_v30 = vpop.permute.xlu0 %767  ;;  %v766_v31 = vpop.permute.xlu1 %765 }
 0x1e9   : > { %v770_v32 = vsel %vm769_vm3, %v764_v28, %v766_v31  ;;  %v771_v37 = vsel %vm769_vm3, %v766_v31, %v768_v30  ;;  %v777_v41 = vadd.f32 %v768_v30, %v756_v15  ;;  %v1123_v28 = vmov 1966171168  }
 0x1ea   : > { %v774_v34 = vadd.f32 %v770_v32, %v754_v10  ;;  %v775_v42 = vadd.f32 %v771_v37, %v747_v14  ;;  %v881_v30 = vunpack.c.l.s4 %v1123_v28  ;;  %v884_v32 = vshrl.u32 %v174_v29, 7 }
 0x1ec   : > { %v804_v35 = vpop.permute.xlu0 %803  ;;  %v802_v36 = vpop.permute.xlu1 %801  ;;  %v882_v31 = vunpack.c.0.s8 %v881_v30 }
 0x1ed   : > { %v807_v38 = vsel %vm787_vm4, %v802_v36, %v804_v35 }
 0x1ee   : > { %v812_v40 = vadd.f32 %v807_v38, %v774_v34 }
 0x1f0   : > { %v839_v43 = vrot.slane %v812_v40, 2  ;;  %v782_v44 = vpop.permute.xlu0 %781  ;;  %v806_v45 = vpop.permute.xlu1 %805 }
 0x1f1   : > { %v808_v46 = vsel %vm787_vm4, %v804_v35, %v806_v45  ;;  %v814_v47 = vadd.f32 %v806_v45, %v777_v41 }
 0x1f2   : > { %v813_v50 = vadd.f32 %v808_v46, %v775_v42  ;;  %842 = vrot.lane.b32.xlu1 %v839_v43, %s1121_s10 }
 0x1f3   : > { %v841_v51 = vrot.slane %v814_v47, 2 }
 0x1f4   : > { %v840_v52 = vrot.slane %v813_v50, 2  ;;  %v786_v53 = vpop.permute.xlu0 %785  ;;  %v784_v54 = vpop.permute.xlu1 %783 }
 0x1f5   : > { %v788_v55 = vsel %vm787_vm4, %v782_v44, %v784_v54  ;;  %v789_v56 = vsel %vm787_vm4, %v784_v54, %v786_v53  ;;  %v795_v8 = vadd.f32 %v786_v53, %v777_v41 }
 0x1f6   : > { %v792_v57 = vadd.f32 %v788_v55, %v774_v34  ;;  %v793_v58 = vadd.f32 %v789_v56, %v775_v42  ;;  %846 = vrot.lane.b32.xlu1 %v841_v51, %s1121_s10  ;;  %844 = vrot.lane.b32.xlu0 %v840_v52, %s1121_s10  ;;  %v885_v34 = vsub.s32 %v882_v31, %v884_v32 }
 0x1f7   : > { %v817_v13 = vadd.f32 %v795_v8, %v173_v9 }
 0x1f8   : > { %v819_v59 = vsel %vm202_vm5, %v793_v58, 0.0  ;;  %v818_v60 = vsel %vm201_vm6, %v792_v57, 0.0  ;;  %v815_v12 = vadd.f32 %v792_v57, %v173_v9  ;;  %v816_v15 = vadd.f32 %v793_v58, %v173_v9 }
 0x1f9   : > { %v823_v61 = vrot.slane %v819_v59, 7  ;;  %v822_v62 = vrot.slane %v818_v60, 7 }
 0x1fb   : > { %826 = vrot.lane.b32.xlu1 %v823_v61, %s1122_s11  ;;  %824 = vrot.lane.b32.xlu0 %v822_v62, %s1122_s11 }
 0x264   : > { %v843_v63 = vpop.permute.xlu1 %842 }
 0x268   : > { %v845_v0 = vpop.permute.xlu0 %844  ;;  %v847_v1 = vpop.permute.xlu1 %846 }
 0x269   : > { %v849_v2 = vsel %vm848_vm7, %v843_v63, %v845_v0  ;;  %v850_v3 = vsel %vm848_vm7, %v845_v0, %v847_v1 }
 0x26a   : > { %v853_v4 = vsel %vm203_vm8, %v849_v2, 0.0  ;;  %v854_v5 = vsel %vm204_vm9, %v850_v3, 0.0 }
 0x26b   : > { %v857_v6 = vrot.slane %v853_v4, 7  ;;  %v858_v7 = vrot.slane %v854_v5, 7 }
 0x26d   : > { %859 = vrot.lane.b32.xlu0 %v857_v6, %s1122_s11  ;;  %861 = vrot.lane.b32.xlu1 %v858_v7, %s1122_s11  ;;  %v825_v10 = vpop.permute.xlu0 %824  ;;  %v827_v11 = vpop.permute.xlu1 %826 }
 0x26e   : > { %v829_v14 = vsel %vm828_vm10, %v825_v10, %v827_v11  ;;  %v833_v16 = vadd.f32 %v825_v10, %v815_v12  ;;  %v835_v17 = vadd.f32 %v827_v11, %v817_v13 }
 0x26f   : > { %v834_v18 = vadd.f32 %v829_v14, %v816_v15 }
 0x2df   : > { %v860_v19 = vpop.permute.xlu0 %859  ;;  %v862_v20 = vpop.permute.xlu1 %861 }
 0x2e0   : > { %v867_v21 = vadd.f32 %v860_v19, %v833_v16  ;;  %v863_v22 = vsel %vm828_vm10, %v860_v19, %v862_v20  ;;  %v869_v23 = vadd.f32 %v862_v20, %v835_v17 }
 0x2e1   : > { %v868_v24 = vadd.f32 %v863_v22, %v834_v18 }
 0x2e2   : > { %v870_v25 = vmul.f32 1.442695, %v867_v21  ;;  %v874_v26 = vmul.f32 1.442695, %v869_v23 }
 0x2e3   : > { %v872_v27 = vmul.f32 1.442695, %v868_v24 }
 0x2e4   : > { %1049 = vpow2.f32 %v870_v25 }
 0x2e5   : > { %1051 = vpow2.f32 %v872_v27 }
 0x2e6   : > { %1053 = vpow2.f32 %v874_v26 }
 0x2f1   : > { %v1050_v33 = vpop.eup %1049 }
 0x2f2   : > { %v1052_v35 = vpop.eup %1051 }
 0x2f3   : > { %v1054_v36 = vpop.eup %1053  ;;  %v879_v37 = vcombine.low %v1050_v33, %v1052_v35 }
 0x2f4   : > { %v893_v39 = vrot.slane %v1054_v36, %v885_v34 }
 0x2f5   : > { %v886_v38 = vrot.slane %v879_v37, %v885_v34 }
 0x2f7   : > { %v894_v40 = vcombine.high %v886_v38, %v893_v39 }
 0x2f9   : > { %v901_v41 = vrot.slane %v894_v40, %v885_v34 }
 0x2fb   : > { %902 = vrot.lane.b32.xlu0 %v901_v41, %s1124_s13 }
 0x36d   : > { %v903_v42 = vpop.permute.xlu0 %902 }
 0x36e   : > { %v904_v43 = vrot.slane %v903_v42, 1 }
 0x370   : > { %v906_v44 = vsel %vm905_vm11, %v903_v42, %v904_v43 }
 0x371   : > { %912 = vst.msk [vmem:[%s164_s25] sm:$0x3] %vm910_vm12, %v906_v44 }
 0x372   : > { %1068 = shalt.err (!%p1065_p3)
}
 0x373   : > { %s1069_s7 = scalar_lea.hbm %s1238_s29, 32  ;;  %s1073_s10 = scalar_lea.hbm %s1276_s3, 64 }
 0x374   : > { %p1070_p4 = scmp.ne.s32.totalorder %s1238_s29, %s1069_s7  ;;  %p1074_p9 = scmp.lt.s32.totalorder %s1238_s29, %s1276_s3 }
 0x375   : > { %p1075_p10 = scmp.lt.s32.totalorder %s1073_s10, %s1069_s7 }
 0x376   : > { %p1071_p7 = pnand %p1070_p4, %p1187_p5 }
 0x377   : > { %p1076_p11 = por %p1075_p10, %p1074_p9 }
 0x378   : > { %p1072_p8 = pneg %p1071_p7 }
 0x37a   : > { %p1077_p12 = pnand %p1076_p11, %p1072_p8 }
 0x37c   : > { %1080 = shalt.err (!%p1077_p12)
}
 0x37d   : > { %1001 = dma.vmem_to_hbm [thread:$0]  (%p1187_p5), %s929_s26, 32, %s1238_s29, %s914_s30  }
 0x37e PF: > { %p1007_p13 = scmp.ge.s32.totalorder %s1115_s17, 2  ;;  %s940_s13 = sand.u32 1, %s1103_s14  }
 0x37f   : > { %s941_s18 = scalar_lea.sflag [#allocation4], %s940_s13 }
 0x380   : > { %p1004_p0 = pnand %p1007_p13, %p1191_p6 }
 0x382   : > { %p1005_p1 = pneg %p1004_p0 }
 0x384   : > { %1098 = dma.done.wait (%p1005_p1), %s941_s18, 32  }
 0x385   : > { %1100 = vsyncadd (%p1005_p1), %s941_s18, 4294967264  ;;  %p14_p2 = scmp.ge.s32.totalorder %s1174_s19, 4   ;;  %s1279_s14 = smov %s1107_s15 }
 0x386   : > { %s1280_s15 = smov %s1111_s16  ;;  %s1281_s16 = smov %s1185_s22 }
 0x387   : > { %s1282_s17 = smov %s1174_s19  ;;  %16 = sbr.rel (!%p14_p2) target bundleno = 5 (0x5), region = 67 }
 0x38c   :  { %946 = vsyncpa [#allocation4], 1 }
 0x38d   :  { %948 = vsyncpa [#allocation4 + $0x1], 1 }

</bundles_post_ra>
